<compile_context>
chip_gen: v7x
topology: tpu7x:2x2x1
jax: 0.10.0
libtpu: 0.0.40
codegen_flags: <defaults>
</compile_context>

<pallas_src>
import jax
import jax.numpy as jnp
from jax import lax
from jax.experimental import pallas as pl
from jax.experimental.pallas import tpu as pltpu


_H_MXU_THRESHOLD = 256   # above this, layer 3 uses the skinny MXU dot


def _mlp_kernel(x_ref, w1_ref, b1_ref, w2_ref, b2_ref, w3_ref, b3_ref, o_ref):
    # x_ref: (tb, F) f32, natural (batch, feature) layout -- cast to bf16 in-kernel.
    xb = x_ref[...].astype(jnp.bfloat16)

    # linear1 (+ dropout1 = identity in eval) + relu.
    # NT-form dot (contract both last dims): h1^T = W1 @ x^T without any wrapper
    # transpose; batch ends up on the lane axis of h1.
    h1 = lax.dot_general(w1_ref[...], xb, (((1,), (1,)), ((), ())),
                         preferred_element_type=jnp.float32)          # (F, tb) f32
    h1 = jnp.maximum(h1 + b1_ref[...], 0.0)                           # (F,1) bias bcast over lanes

    # linear2 (+ dropout2 = identity in eval) + relu.
    h2 = jnp.dot(w2_ref[...], h1.astype(jnp.bfloat16),
                 preferred_element_type=jnp.float32)                  # (H, tb) f32
    h2 = jnp.maximum(h2 + b2_ref[...], 0.0)

    # linear3 (out_features == 1).
    if w3_ref.shape[1] == 1:
        # Small H: VPU multiply + XLU sublane reduce; skips a 1-column MXU matmul
        # and keeps the output lane-dense.
        out = jnp.sum(h2 * w3_ref[...], axis=0, keepdims=True)        # (1, tb) f32
    else:
        # Large H: skinny (1, H) @ (H, tb) MXU dot offloads the reduction to the
        # otherwise-idle MXU slot.
        out = jnp.dot(w3_ref[...], h2, preferred_element_type=jnp.float32)

    o_ref[...] = (out + b3_ref[0, 0]).astype(o_ref.dtype)             # scalar bias from SMEM


def _choose_batch_tile(B, requested):
    """Lane-dense batch tile; >=2 grid steps when B >= 256 (v7x megacore)."""
    if B <= 128:
        return B                                   # single full-dim block
    requested = max(128, (requested // 128) * 128)
    two_step_cap = 128 * ((B + 255) // 256)        # ensures cdiv(B, tb) >= 2
    return min(requested, two_step_cap)


def _vmem_limit_bytes(F, H, tb, weight_bufs):
    """Explicit VMEM budget derived from shapes (review: re-derive for 64 MiB v7x)."""
    x_io = 2 * tb * F * 4                          # double-buffered f32 x tiles
    out_io = 2 * tb * 4                            # double-buffered (1, tb) f32 out tiles
    wts = weight_bufs * (F * F * 2 + H * F * 2 + (F + 2 * H + 4) * 4)
    interm = tb * (2 * F + 4 * F + 2 * F + 4 * H + 4 * H) + 64 * 1024
    need = x_io + out_io + wts + interm
    # 32 MiB floor (compiler headroom), 64 MiB ceiling (fits v7x physical VMEM;
    # v5e/v6e have 128 MiB so requesting 64 MiB is always legal there).
    return int(min(max(32 * 1024 * 1024, 2 * need), 64 * 1024 * 1024))


def mlp_forward(x, params, *, batch_tile=1024):
    """x: (B, F) float32. Returns (B, 1) float32."""
    B, F = x.shape
    H = params["w2"].shape[0]

    tb = _choose_batch_tile(B, batch_tile)
    grid = (pl.cdiv(B, tb),)                       # ragged last block handled by Pallas masking

    # Layer-3 weight layout depends on which in-kernel path is used.
    use_mxu_l3 = H > _H_MXU_THRESHOLD
    w3 = params["w3"].T if use_mxu_l3 else params["w3"]   # (1, H) for MXU, (H, 1) for VPU

    cost = pl.CostEstimate(
        flops=2 * B * (F * F + F * H + H),
        transcendentals=0,
        bytes_accessed=B * F * 4 + (F * F + H * F) * 2 + (F + 2 * H + 1) * 4 + B * 4,
    )

    def run(single_buffer_weights):
        wkw = {"pipeline_mode": pl.Buffered(1)} if single_buffer_weights else {}
        weight_bufs = 1 if single_buffer_weights else 2
        const = lambda i: (0, 0)                   # weights/biases resident across grid steps
        return pl.pallas_call(
            _mlp_kernel,
            out_shape=jax.ShapeDtypeStruct((1, B), jnp.float32),
            grid=grid,
            in_specs=[
                pl.BlockSpec((tb, F), lambda i: (i, 0)),       # x, natural layout, tiled over batch
                pl.BlockSpec((F, F), const, **wkw),            # w1 (bf16, resident)
                pl.BlockSpec((F, 1), const, **wkw),            # b1 column (f32)
                pl.BlockSpec((H, F), const, **wkw),            # w2 (bf16, resident)
                pl.BlockSpec((H, 1), const, **wkw),            # b2 column (f32)
                pl.BlockSpec(w3.shape, const, **wkw),          # w3 (f32)
                pl.BlockSpec(memory_space=pltpu.SMEM),         # b3 scalar in SMEM
            ],
            out_specs=pl.BlockSpec((1, tb), lambda i: (0, i)), # lane-dense output
            compiler_params=pltpu.CompilerParams(
                dimension_semantics=("parallel",),             # megacore shard on v7x
                vmem_limit_bytes=_vmem_limit_bytes(F, H, tb, weight_bufs),
            ),
            cost_estimate=cost,
        )(x, params["w1"], params["b1"], params["w2"], params["b2"], w3, params["b3"])

    try:
        out = run(True)      # grid-invariant inputs single-buffered (pl.Buffered(1))
    except Exception:        # fallback if this jax build rejects buffer_count=1
        out = run(False)

    return out.reshape(B, 1)


def init_params(key, in_feature):
    """nn.Linear-style init U(-1/sqrt(fan_in), 1/sqrt(fan_in)); MXU weights in bf16."""
    hid = in_feature // 2
    keys = jax.random.split(key, 6)

    def uniform(k, shape, fan_in, dtype=jnp.float32):
        bound = 1.0 / jnp.sqrt(jnp.float32(fan_in))
        return jax.random.uniform(k, shape, jnp.float32, -bound, bound).astype(dtype)

    return {
        "w1": uniform(keys[0], (in_feature, in_feature), in_feature, jnp.bfloat16),
        "b1": uniform(keys[1], (in_feature, 1), in_feature),
        "w2": uniform(keys[2], (hid, in_feature), in_feature, jnp.bfloat16),
        "b2": uniform(keys[3], (hid, 1), in_feature),
        "w3": uniform(keys[4], (hid, 1), hid),   # torch (1, hid), stored transposed
        "b3": uniform(keys[5], (1, 1), hid),
    }


def _reference(x, p):
    """Pure-JAX reference mirroring the kernel's dtype handling."""
    xb = x.astype(jnp.bfloat16)
    h1 = jnp.dot(xb, p["w1"].T, preferred_element_type=jnp.float32) + p["b1"][:, 0]
    h1 = jnp.maximum(h1, 0.0)
    h2 = jnp.dot(h1.astype(jnp.bfloat16), p["w2"].T,
                 preferred_element_type=jnp.float32) + p["b2"][:, 0]
    h2 = jnp.maximum(h2, 0.0)
    return jnp.dot(h2, p["w3"]) + p["b3"]


if __name__ == "__main__":
    key = jax.random.PRNGKey(0)
    k_param, k_x1, k_x2 = jax.random.split(key, 3)

    B, F = 8, 32
    params = init_params(k_param, F)

    # Small case: single full-array block.
    x = jax.random.normal(k_x1, (B, F), jnp.float32)
    out = mlp_forward(x, params)
    jax.block_until_ready(out)
    assert out.shape == (B, 1)
    assert jnp.allclose(out, _reference(x, params), atol=1e-3, rtol=1e-3)

    # Larger ragged case: multi-step grid (>=2 steps, v7x megacore) with 128-lane
    # tiles and masked boundary handling -- no wrapper-side transpose/cast/pad.
    B2 = 300
    x2 = jax.random.normal(k_x2, (B2, F), jnp.float32)
    out2 = mlp_forward(x2, params, batch_tile=128)
    jax.block_until_ready(out2)
    assert out2.shape == (B2, 1)
    assert jnp.allclose(out2, _reference(x2, params), atol=1e-3, rtol=1e-3)

    print("KERNEL_OK")
</pallas_src>

<mosaic_0001>
module attributes {stable_mosaic.version = 11 : i64} {
  func.func @_mlp_kernel(%arg0: i32, %arg1: memref<8x32xf32, #tpu.memory_space<vmem>>, %arg2: memref<32x32xbf16, #tpu.memory_space<vmem>>, %arg3: memref<32x1xf32, #tpu.memory_space<vmem>>, %arg4: memref<16x32xbf16, #tpu.memory_space<vmem>>, %arg5: memref<16x1xf32, #tpu.memory_space<vmem>>, %arg6: memref<16x1xf32, #tpu.memory_space<vmem>>, %arg7: memref<1x1xf32, #tpu.memory_space<smem>>, %arg8: memref<1x8xf32, #tpu.memory_space<vmem>>) attributes {dimension_semantics = [#tpu.dimension_semantics<parallel>], iteration_bounds = array<i64: 1>, scalar_prefetch = 0 : i64, scratch_operands = 0 : i64, tpu.core_type = #tpu.core_type<tc>, window_params = [{transform_indices = @transform_0, window_bounds = array<i64: 8, 32>}, {pipeline_mode = #tpu.pipeline_mode<synchronous>, transform_indices = @transform_1, window_bounds = array<i64: 32, 32>}, {pipeline_mode = #tpu.pipeline_mode<synchronous>, transform_indices = @transform_2, window_bounds = array<i64: 32, 1>}, {pipeline_mode = #tpu.pipeline_mode<synchronous>, transform_indices = @transform_3, window_bounds = array<i64: 16, 32>}, {pipeline_mode = #tpu.pipeline_mode<synchronous>, transform_indices = @transform_4, window_bounds = array<i64: 16, 1>}, {pipeline_mode = #tpu.pipeline_mode<synchronous>, transform_indices = @transform_5, window_bounds = array<i64: 16, 1>}, {transform_indices = @transform_6, window_bounds = array<i64: 1, 1>}, {transform_indices = @transform_7, window_bounds = array<i64: 1, 8>}]} {
    %c0 = arith.constant 0 : index
    %c0_0 = arith.constant 0 : index
    %0 = vector.load %arg1[%c0, %c0_0] : memref<8x32xf32, #tpu.memory_space<vmem>>, vector<8x32xf32>
    %1 = arith.truncf %0 : vector<8x32xf32> to vector<8x32xbf16>
    %c0_1 = arith.constant 0 : index
    %c0_2 = arith.constant 0 : index
    %2 = vector.load %arg2[%c0_1, %c0_2] : memref<32x32xbf16, #tpu.memory_space<vmem>>, vector<32x32xbf16>
    %cst = arith.constant dense<0.000000e+00> : vector<32x8xf32>
    %3 = tpu.matmul %2, %1, %cst {dimension_numbers = #tpu.dot_dimension_numbers<[1], [1], [0], [0], [0, 0, 1, 0], [], []>} : vector<32x32xbf16>, vector<8x32xbf16>, vector<32x8xf32> -> vector<32x8xf32>
    %c0_3 = arith.constant 0 : index
    %c0_4 = arith.constant 0 : index
    %4 = vector.load %arg3[%c0_3, %c0_4] : memref<32x1xf32, #tpu.memory_space<vmem>>, vector<32x1xf32>
    %5 = vector.broadcast %4 : vector<32x1xf32> to vector<32x8xf32>
    %6 = arith.addf %3, %5 : vector<32x8xf32>
    %cst_5 = arith.constant 0.000000e+00 : f32
    %7 = vector.broadcast %cst_5 : f32 to vector<32x8xf32>
    %8 = arith.maximumf %6, %7 : vector<32x8xf32>
    %c0_6 = arith.constant 0 : index
    %c0_7 = arith.constant 0 : index
    %9 = vector.load %arg4[%c0_6, %c0_7] : memref<16x32xbf16, #tpu.memory_space<vmem>>, vector<16x32xbf16>
    %10 = arith.truncf %8 : vector<32x8xf32> to vector<32x8xbf16>
    %cst_8 = arith.constant dense<0.000000e+00> : vector<16x8xf32>
    %11 = tpu.matmul %9, %10, %cst_8 {dimension_numbers = #tpu.dot_dimension_numbers<[1], [0], [0], [1], [0, 0, 1, 1], [], []>} : vector<16x32xbf16>, vector<32x8xbf16>, vector<16x8xf32> -> vector<16x8xf32>
    %c0_9 = arith.constant 0 : index
    %c0_10 = arith.constant 0 : index
    %12 = vector.load %arg5[%c0_9, %c0_10] : memref<16x1xf32, #tpu.memory_space<vmem>>, vector<16x1xf32>
    %13 = vector.broadcast %12 : vector<16x1xf32> to vector<16x8xf32>
    %14 = arith.addf %11, %13 : vector<16x8xf32>
    %cst_11 = arith.constant 0.000000e+00 : f32
    %15 = vector.broadcast %cst_11 : f32 to vector<16x8xf32>
    %16 = arith.maximumf %14, %15 : vector<16x8xf32>
    %c0_12 = arith.constant 0 : index
    %c0_13 = arith.constant 0 : index
    %17 = vector.load %arg6[%c0_12, %c0_13] : memref<16x1xf32, #tpu.memory_space<vmem>>, vector<16x1xf32>
    %18 = vector.broadcast %17 : vector<16x1xf32> to vector<16x8xf32>
    %19 = arith.mulf %16, %18 : vector<16x8xf32>
    %cst_14 = arith.constant dense<0.000000e+00> : vector<8xf32>
    %20 = vector.multi_reduction <add>, %19, %cst_14 [0] : vector<16x8xf32> to vector<8xf32>
    %21 = vector.shape_cast %20 : vector<8xf32> to vector<1x8xf32>
    %c0_15 = arith.constant 0 : index
    %c0_16 = arith.constant 0 : index
    %22 = memref.load %arg7[%c0_15, %c0_16] : memref<1x1xf32, #tpu.memory_space<smem>>
    %23 = vector.broadcast %22 : f32 to vector<1x8xf32>
    %24 = arith.addf %21, %23 : vector<1x8xf32>
    %c0_17 = arith.constant 0 : index
    %c0_18 = arith.constant 0 : index
    %25 = vector.load %arg8[%c0_17, %c0_18] : memref<1x8xf32, #tpu.memory_space<vmem>>, vector<1x8xf32>
    tpu.vector_store %arg8[%c0_17, %c0_18], %24 {strides = array<i32>} : memref<1x8xf32, #tpu.memory_space<vmem>>, vector<1x8xf32>,
    return
  }
  func.func @transform_0(%arg0: i32) -> (i32, i32) {
    %c0_i32 = arith.constant 0 : i32
    %c0_i32_0 = arith.constant 0 : i32
    return %arg0, %c0_i32 : i32, i32
  }
  func.func @transform_1(%arg0: i32) -> (i32, i32) {
    %c0_i32 = arith.constant 0 : i32
    %c0_i32_0 = arith.constant 0 : i32
    %c0_i32_1 = arith.constant 0 : i32
    return %c0_i32, %c0_i32_0 : i32, i32
  }
  func.func @transform_2(%arg0: i32) -> (i32, i32) {
    %c0_i32 = arith.constant 0 : i32
    %c0_i32_0 = arith.constant 0 : i32
    %c0_i32_1 = arith.constant 0 : i32
    return %c0_i32, %c0_i32_0 : i32, i32
  }
  func.func @transform_3(%arg0: i32) -> (i32, i32) {
    %c0_i32 = arith.constant 0 : i32
    %c0_i32_0 = arith.constant 0 : i32
    %c0_i32_1 = arith.constant 0 : i32
    return %c0_i32, %c0_i32_0 : i32, i32
  }
  func.func @transform_4(%arg0: i32) -> (i32, i32) {
    %c0_i32 = arith.constant 0 : i32
    %c0_i32_0 = arith.constant 0 : i32
    %c0_i32_1 = arith.constant 0 : i32
    return %c0_i32, %c0_i32_0 : i32, i32
  }
  func.func @transform_5(%arg0: i32) -> (i32, i32) {
    %c0_i32 = arith.constant 0 : i32
    %c0_i32_0 = arith.constant 0 : i32
    %c0_i32_1 = arith.constant 0 : i32
    return %c0_i32, %c0_i32_0 : i32, i32
  }
  func.func @transform_6(%arg0: i32) -> (i32, i32) {
    %c0_i32 = arith.constant 0 : i32
    %c0_i32_0 = arith.constant 0 : i32
    %c0_i32_1 = arith.constant 0 : i32
    return %c0_i32, %c0_i32_0 : i32, i32
  }
  func.func @transform_7(%arg0: i32) -> (i32, i32) {
    %c0_i32 = arith.constant 0 : i32
    %c0_i32_0 = arith.constant 0 : i32
    return %c0_i32, %arg0 : i32, i32
  }
}

module attributes {stable_mosaic.version = 11 : i64} {
  func.func @_mlp_kernel(%arg0: i32, %arg1: memref<8x32xf32, #tpu.memory_space<vmem>>, %arg2: memref<32x32xbf16, #tpu.memory_space<vmem>>, %arg3: memref<32x1xf32, #tpu.memory_space<vmem>>, %arg4: memref<16x32xbf16, #tpu.memory_space<vmem>>, %arg5: memref<16x1xf32, #tpu.memory_space<vmem>>, %arg6: memref<16x1xf32, #tpu.memory_space<vmem>>, %arg7: memref<1x1xf32, #tpu.memory_space<smem>>, %arg8: memref<1x8xf32, #tpu.memory_space<vmem>>) attributes {dimension_semantics = [#tpu.dimension_semantics<parallel>], iteration_bounds = array<i64: 1>, scalar_prefetch = 0 : i64, scratch_operands = 0 : i64, tpu.core_type = #tpu.core_type<tc>, window_params = [{transform_indices = @transform_0, window_bounds = array<i64: 8, 32>}, {pipeline_mode = #tpu.pipeline_mode<synchronous>, transform_indices = @transform_1, window_bounds = array<i64: 32, 32>}, {pipeline_mode = #tpu.pipeline_mode<synchronous>, transform_indices = @transform_2, window_bounds = array<i64: 32, 1>}, {pipeline_mode = #tpu.pipeline_mode<synchronous>, transform_indices = @transform_3, window_bounds = array<i64: 16, 32>}, {pipeline_mode = #tpu.pipeline_mode<synchronous>, transform_indices = @transform_4, window_bounds = array<i64: 16, 1>}, {pipeline_mode = #tpu.pipeline_mode<synchronous>, transform_indices = @transform_5, window_bounds = array<i64: 16, 1>}, {transform_indices = @transform_6, window_bounds = array<i64: 1, 1>}, {transform_indices = @transform_7, window_bounds = array<i64: 1, 8>}]} {
    %c0 = arith.constant 0 : index
    %c0_0 = arith.constant 0 : index
    %0 = vector.load %arg1[%c0, %c0_0] : memref<8x32xf32, #tpu.memory_space<vmem>>, vector<8x32xf32>
    %1 = arith.truncf %0 : vector<8x32xf32> to vector<8x32xbf16>
    %c0_1 = arith.constant 0 : index
    %c0_2 = arith.constant 0 : index
    %2 = vector.load %arg2[%c0_1, %c0_2] : memref<32x32xbf16, #tpu.memory_space<vmem>>, vector<32x32xbf16>
    %cst = arith.constant dense<0.000000e+00> : vector<32x8xf32>
    %3 = tpu.matmul %2, %1, %cst {dimension_numbers = #tpu.dot_dimension_numbers<[1], [1], [0], [0], [0, 0, 1, 0], [], []>} : vector<32x32xbf16>, vector<8x32xbf16>, vector<32x8xf32> -> vector<32x8xf32>
    %c0_3 = arith.constant 0 : index
    %c0_4 = arith.constant 0 : index
    %4 = vector.load %arg3[%c0_3, %c0_4] : memref<32x1xf32, #tpu.memory_space<vmem>>, vector<32x1xf32>
    %5 = vector.broadcast %4 : vector<32x1xf32> to vector<32x8xf32>
    %6 = arith.addf %3, %5 : vector<32x8xf32>
    %cst_5 = arith.constant 0.000000e+00 : f32
    %7 = vector.broadcast %cst_5 : f32 to vector<32x8xf32>
    %8 = arith.maximumf %6, %7 : vector<32x8xf32>
    %c0_6 = arith.constant 0 : index
    %c0_7 = arith.constant 0 : index
    %9 = vector.load %arg4[%c0_6, %c0_7] : memref<16x32xbf16, #tpu.memory_space<vmem>>, vector<16x32xbf16>
    %10 = arith.truncf %8 : vector<32x8xf32> to vector<32x8xbf16>
    %cst_8 = arith.constant dense<0.000000e+00> : vector<16x8xf32>
    %11 = tpu.matmul %9, %10, %cst_8 {dimension_numbers = #tpu.dot_dimension_numbers<[1], [0], [0], [1], [0, 0, 1, 1], [], []>} : vector<16x32xbf16>, vector<32x8xbf16>, vector<16x8xf32> -> vector<16x8xf32>
    %c0_9 = arith.constant 0 : index
    %c0_10 = arith.constant 0 : index
    %12 = vector.load %arg5[%c0_9, %c0_10] : memref<16x1xf32, #tpu.memory_space<vmem>>, vector<16x1xf32>
    %13 = vector.broadcast %12 : vector<16x1xf32> to vector<16x8xf32>
    %14 = arith.addf %11, %13 : vector<16x8xf32>
    %cst_11 = arith.constant 0.000000e+00 : f32
    %15 = vector.broadcast %cst_11 : f32 to vector<16x8xf32>
    %16 = arith.maximumf %14, %15 : vector<16x8xf32>
    %c0_12 = arith.constant 0 : index
    %c0_13 = arith.constant 0 : index
    %17 = vector.load %arg6[%c0_12, %c0_13] : memref<16x1xf32, #tpu.memory_space<vmem>>, vector<16x1xf32>
    %18 = vector.broadcast %17 : vector<16x1xf32> to vector<16x8xf32>
    %19 = arith.mulf %16, %18 : vector<16x8xf32>
    %cst_14 = arith.constant dense<0.000000e+00> : vector<8xf32>
    %20 = vector.multi_reduction <add>, %19, %cst_14 [0] : vector<16x8xf32> to vector<8xf32>
    %21 = vector.shape_cast %20 : vector<8xf32> to vector<1x8xf32>
    %c0_15 = arith.constant 0 : index
    %c0_16 = arith.constant 0 : index
    %22 = memref.load %arg7[%c0_15, %c0_16] : memref<1x1xf32, #tpu.memory_space<smem>>
    %23 = vector.broadcast %22 : f32 to vector<1x8xf32>
    %24 = arith.addf %21, %23 : vector<1x8xf32>
    %c0_17 = arith.constant 0 : index
    %c0_18 = arith.constant 0 : index
    %25 = vector.load %arg8[%c0_17, %c0_18] : memref<1x8xf32, #tpu.memory_space<vmem>>, vector<1x8xf32>
    tpu.vector_store %arg8[%c0_17, %c0_18], %24 {strides = array<i32>} : memref<1x8xf32, #tpu.memory_space<vmem>>, vector<1x8xf32>,
    return
  }
  func.func @transform_0(%arg0: i32) -> (i32, i32) {
    %c0_i32 = arith.constant 0 : i32
    %c0_i32_0 = arith.constant 0 : i32
    return %arg0, %c0_i32 : i32, i32
  }
  func.func @transform_1(%arg0: i32) -> (i32, i32) {
    %c0_i32 = arith.constant 0 : i32
    %c0_i32_0 = arith.constant 0 : i32
    %c0_i32_1 = arith.constant 0 : i32
    return %c0_i32, %c0_i32_0 : i32, i32
  }
  func.func @transform_2(%arg0: i32) -> (i32, i32) {
    %c0_i32 = arith.constant 0 : i32
    %c0_i32_0 = arith.constant 0 : i32
    %c0_i32_1 = arith.constant 0 : i32
    return %c0_i32, %c0_i32_0 : i32, i32
  }
  func.func @transform_3(%arg0: i32) -> (i32, i32) {
    %c0_i32 = arith.constant 0 : i32
    %c0_i32_0 = arith.constant 0 : i32
    %c0_i32_1 = arith.constant 0 : i32
    return %c0_i32, %c0_i32_0 : i32, i32
  }
  func.func @transform_4(%arg0: i32) -> (i32, i32) {
    %c0_i32 = arith.constant 0 : i32
    %c0_i32_0 = arith.constant 0 : i32
    %c0_i32_1 = arith.constant 0 : i32
    return %c0_i32, %c0_i32_0 : i32, i32
  }
  func.func @transform_5(%arg0: i32) -> (i32, i32) {
    %c0_i32 = arith.constant 0 : i32
    %c0_i32_0 = arith.constant 0 : i32
    %c0_i32_1 = arith.constant 0 : i32
    return %c0_i32, %c0_i32_0 : i32, i32
  }
  func.func @transform_6(%arg0: i32) -> (i32, i32) {
    %c0_i32 = arith.constant 0 : i32
    %c0_i32_0 = arith.constant 0 : i32
    %c0_i32_1 = arith.constant 0 : i32
    return %c0_i32, %c0_i32_0 : i32, i32
  }
  func.func @transform_7(%arg0: i32) -> (i32, i32) {
    %c0_i32 = arith.constant 0 : i32
    %c0_i32_0 = arith.constant 0 : i32
    return %c0_i32, %arg0 : i32, i32
  }
}

</mosaic_0001>

<bundles_post_ra>
// kernel: tpu_custom_call.1
= control target key start
LH: loop header
LB: loop body
LE: loop exit
PB: predicated region body
PF: predicated region fallthrough
CT: control target
= control target key end

     0   :  { %vm69_vm0 = vcmask 261120   ;;  %v302_v3 = vmov 0   ;;  %s402_s0 = inlined_call_operand.vmem [shape: f32[8,32], index: 0, kind: input, shape index: {}]   ;;  %s403_s1 = inlined_call_operand.vmem [shape: bf16[32,32], index: 1, kind: input, shape index: {}]   ;;  %s404_s2 = inlined_call_operand.vmem [shape: f32[32,1], index: 2, kind: input, shape index: {}]   ;;  %s405_s3 = inlined_call_operand.vmem [shape: bf16[16,32], index: 3, kind: input, shape index: {}]   ;;  %s406_s4 = inlined_call_operand.vmem [shape: f32[16,1], index: 4, kind: input, shape index: {}]   ;;  %s407_s5 = inlined_call_operand.vmem [shape: f32[16,1], index: 5, kind: input, shape index: {}]   ;;  %s408_s6 = inlined_call_operand.<no memory space> [shape: f32[1,1], index: 6, kind: input, shape index: {}]   ;;  %s409_s7 = inlined_call_operand.hbm [shape: f32[1,8], index: 7, kind: output, shape index: {}]  }
   0x1   :  { %v29_v0 = vld [vmem:[%s402_s0] sm:$0xff]  ;;  %273 = vset.pattern.permute.xlu0 %v302_v3  ;;  %274 = vset.pattern.permute.xlu1 %v302_v3  ;;  %v37_v5 = vld [vmem:[%s404_s2 + $0x10] sm:$0xff]  ;;  %v36_v7 = vld [vmem:[%s404_s2 + $0x8] sm:$0xff] }
   0x2   :  { %v30_v1 = vpack.c.bf16 %v29_v0, %v29_v0  ;;  %v275_v2 = vld [vmem:[%s403_s1] sm:$0xff]   ;;  %51 = vperm.xlu1 %274, %v37_v5  }
   0x3   :  { %v35_v4 = vld [vmem:[%s404_s2] sm:$0xff]  ;;  %256 = vmatprep.mubr.msk.bf16.mxu0 %vm69_vm0, %v275_v2 }
   0x4   :  { %268 = vmatprep.subr.msk.bf16.mxu0 %vm69_vm0, %v30_v1  ;;  %v77_v6 = vsel %vm69_vm0, %v30_v1, 0  ;;  %41 = vperm.xlu0 %273, %v35_v4  }
   0x5   :  { %255 = vmatpush3.bf16.xpose.msra.mxu0 %v77_v6 }
   0x6   :  { %13 = vsyncpa [#allocation4], 0  ;;  %v38_v8 = vld [vmem:[%s404_s2 + $0x18] sm:$0xff]  ;;  %v276_v9 = vld [vmem:[%s403_s1 + $0x8] sm:$0xff]   ;;  %v303_v14 = vmov 0.0   ;;  %vm304_vm1 = vmmov 0   ;;  %v224_v56 = vstv %s408_s6 }
   0x7   :  { %56 = vperm.xlu1 %274, %v38_v8   ;;  %v136_v10 = vld [vmem:[%s406_s4] sm:$0xff]  ;;  %v137_v11 = vld [vmem:[%s406_s4 + $0x8] sm:$0xff]  ;;  %260 = vmatprep.subr.bf16.mxu1 %v303_v14  ;;  %vm213_vm2 = vcmask 64512   ;;  %s305_s21 = smov [#allocation3]   ;;  %vm226_vm3 = vcmask 57344  }
   0x8   :  { %46 = vperm.xlu0 %273, %v36_v7   ;;  %v199_v12 = vld [vmem:[%s407_s5] sm:$0xff]  ;;  %v200_v13 = vld [vmem:[%s407_s5 + $0x8] sm:$0xff]  ;;  %264 = vmatprep.mubr.msk.bf16.mxu1 %vm304_vm1, %v303_v14  ;;  %s234_s22 = sshll.u32 %s305_s21, 4  ;;  %s235_s22 = int_to_ptr.vmem [resolvable:$true] %s234_s22 }
   0x9   :  { %v277_v33 = vld [vmem:[%s405_s3] sm:$0xff]   ;;  %s278_s23 = scalar_lea.vmem %s235_s22, 16  ;;  %s282_s24 = scalar_lea.vmem %s235_s22, 32 }
   0xa   :  { %p279_p0 = scmp.ne.s32.totalorder %s235_s22, %s278_s23  ;;  %p283_p1 = scmp.lt.s32.totalorder %s235_s22, %s235_s22 }
   0xb   :  { %145 = vperm.xlu1 %274, %v137_v11   ;;  %p284_p2 = scmp.lt.s32.totalorder %s282_s24, %s278_s23 }
   0xc   :  { %257 = vmatmul.mubr.msk.bf16.vlgmr.msra.gmra.mrb[0].mxu0 %vm69_vm0, %v276_v9  ;;  %140 = vperm.xlu0 %273, %v136_v10  }
   0xd   :  { %p285_p3 = por %p284_p2, %p283_p1 }
   0xf   :  { %208 = vperm.xlu1 %274, %v200_v13   ;;  %p286_p4 = pnand %p285_p3, %p279_p0 }
  0x10   :  { %203 = vperm.xlu0 %273, %v199_v12  }
  0x81   :  { %v52_v15 = vpop.permute.xlu1 %51 }
  0x83   :  { %v42_v16 = vpop.permute.xlu0 %41 }
  0x86   :  { %v57_v20 = vpop.permute.xlu1 %56 }
  0x87   :  { %v47_v23 = vpop.permute.xlu0 %46 }
  0x8a   :  { %v146_v35 = vpop.permute.xlu1 %145 }
  0x8b   :  { %v141_v34 = vpop.permute.xlu0 %140 }
  0x8e   :  { %v209_v46 = vpop.permute.xlu1 %208 }
  0x8f   :  { %v204_v43 = vpop.permute.xlu0 %203 }
  0xdf   :  { %v258_v17 = vpop.f32.mrb[0].mxu0 }
  0xe0   :  { %v122_v18 = vadd.f32 %v258_v17, %v52_v15  ;;  %v113_v19 = vpop.f32.mrb[1].mxu0 }
  0xe1   :  { %v114_v21 = vadd.f32 %v113_v19, %v42_v16  ;;  %v259_v22 = vpop.f32.mrb[2].mxu0 }
  0xe2   :  { %v125_v24 = vadd.f32 %v259_v22, %v57_v20  ;;  %v116_v25 = vpop.f32.mrb[3].mxu0  ;;  %v130_v27 = vmax.f32 %v122_v18, 0.0 }
  0xe3   :  { %v117_v26 = vadd.f32 %v116_v25, %v47_v23  ;;  %v128_v29 = vmax.f32 %v114_v21, 0.0 }
  0xe4   :  { %v131_v28 = vmax.f32 %v125_v24, 0.0 }
  0xe5   :  { %v129_v30 = vmax.f32 %v117_v26, 0.0 }
  0xe6   :  { %v135_v31 = vpack.c.bf16 %v131_v28, %v130_v27 }
  0xe7   :  { %v134_v32 = vpack.c.bf16 %v129_v30, %v128_v29 }
  0xe9   :  { %261 = vmatpush3.bf16.msra.mxu1 %v134_v32 }
  0xea   :  { %262 = vmatprep.subr.bf16.mxu1 %v303_v14 }
  0xed   :  { %263 = vmatpush3.bf16.msra.mxu1 %v135_v31 }
  0xf0   :  { %265 = vmatmul.mubr.msk.bf16.vlgmr.msra.gmra.mrb[0].mxu1 %vm69_vm0, %v277_v33 }
 0x1c3   :  { %v190_v36 = vpop.f32.mrb[0].mxu1 }
 0x1c4   :  { %v191_v37 = vadd.f32 %v190_v36, %v141_v34  ;;  %v266_v38 = vpop.f32.mrb[1].mxu1 }
 0x1c5   :  { %v193_v39 = vpop.f32.mrb[2].mxu1 }
 0x1c6   :  { %v197_v40 = vmax.f32 %v191_v37, 0.0  ;;  %v194_v41 = vadd.f32 %v193_v39, %v146_v35  ;;  %v267_v42 = vpop.f32.mrb[3].mxu1 }
 0x1c8   :  { %v211_v44 = vmul.f32 %v204_v43, %v197_v40  ;;  %v198_v45 = vmax.f32 %v194_v41, 0.0 }
 0x1ca   :  { %v212_v47 = vmul.f32 %v209_v46, %v198_v45  ;;  %v214_v48 = vsel %vm213_vm2, %v211_v44, 0.0 }
 0x1cc   :  { %v215_v49 = vsel %vm213_vm2, %v212_v47, 0.0 }
 0x1cd   :  { %v216_v50 = vadd.f32 %v215_v49, %v214_v48 }
 0x1cf   :  { %v217_v51 = vrot.slane %v216_v50, 4 }
 0x1d1   :  { %v218_v52 = vadd.f32 %v217_v51, %v216_v50 }
 0x1d3   :  { %v219_v53 = vrot.slane %v218_v52, 2 }
 0x1d5   :  { %v220_v54 = vadd.f32 %v219_v53, %v218_v52 }
 0x1d7   :  { %v221_v55 = vrot.slane %v220_v54, 1 }
 0x1d9   :  { %v222_v57 = vadd.f32 %v221_v55, %v220_v54 }
 0x1db   :  { %v225_v58 = vadd.f32 %v224_v56, %v222_v57 }
 0x1dd   :  { %227 = vst.msk [vmem:[#allocation3] sm:$0x1] %vm226_vm3, %v225_v58 }
 0x1de   :  { %289 = shalt.err (!%p286_p4)
}
 0x1df   :  { %s290_s27 = scalar_lea.hbm %s409_s7, 16 }
 0x1e0   :  { %p291_p5 = scmp.ne.s32.totalorder %s409_s7, %s290_s27  ;;  %p294_p6 = scmp.lt.u32.totalorder %s290_s27, %s409_s7 }
 0x1e2   :  { %p296_p7 = pnand %p294_p6, %p291_p5 }
 0x1e4   :  { %299 = shalt.err (!%p296_p7)
}
 0x1e5   :  { %237 = dma.vmem_to_hbm [thread:$0]  %s235_s22, 16, %s409_s7, [#allocation4]  }
 0x1e6   :  { %300 = dma.done.wait [#allocation4], 16  }
 0x1e7   :  { %301 = vsyncadd [#allocation4], 4294967280 }
 0x1e8   :  { %241 = vsyncpa [#allocation4], 1 }

// kernel: tpu_custom_call.1
= control target key start
LH: loop header
LB: loop body
LE: loop exit
PB: predicated region body
PF: predicated region fallthrough
CT: control target
= control target key end

     0   :  { %vm69_vm0 = vcmask 261120   ;;  %v302_v3 = vmov 0   ;;  %s402_s0 = inlined_call_operand.vmem [shape: f32[8,32], index: 0, kind: input, shape index: {}]   ;;  %s403_s1 = inlined_call_operand.vmem [shape: bf16[32,32], index: 1, kind: input, shape index: {}]   ;;  %s404_s2 = inlined_call_operand.vmem [shape: f32[32,1], index: 2, kind: input, shape index: {}]   ;;  %s405_s3 = inlined_call_operand.vmem [shape: bf16[16,32], index: 3, kind: input, shape index: {}]   ;;  %s406_s4 = inlined_call_operand.vmem [shape: f32[16,1], index: 4, kind: input, shape index: {}]   ;;  %s407_s5 = inlined_call_operand.vmem [shape: f32[16,1], index: 5, kind: input, shape index: {}]   ;;  %s408_s6 = inlined_call_operand.<no memory space> [shape: f32[1,1], index: 6, kind: input, shape index: {}]   ;;  %s409_s7 = inlined_call_operand.hbm [shape: f32[1,8], index: 7, kind: output, shape index: {}]  }
   0x1   :  { %v29_v0 = vld [vmem:[%s402_s0] sm:$0xff]  ;;  %273 = vset.pattern.permute.xlu0 %v302_v3  ;;  %274 = vset.pattern.permute.xlu1 %v302_v3  ;;  %v37_v5 = vld [vmem:[%s404_s2 + $0x10] sm:$0xff]  ;;  %v36_v7 = vld [vmem:[%s404_s2 + $0x8] sm:$0xff] }
   0x2   :  { %v30_v1 = vpack.c.bf16 %v29_v0, %v29_v0  ;;  %v275_v2 = vld [vmem:[%s403_s1] sm:$0xff]   ;;  %51 = vperm.xlu1 %274, %v37_v5  }
   0x3   :  { %v35_v4 = vld [vmem:[%s404_s2] sm:$0xff]  ;;  %256 = vmatprep.mubr.msk.bf16.mxu0 %vm69_vm0, %v275_v2 }
   0x4   :  { %268 = vmatprep.subr.msk.bf16.mxu0 %vm69_vm0, %v30_v1  ;;  %v77_v6 = vsel %vm69_vm0, %v30_v1, 0  ;;  %41 = vperm.xlu0 %273, %v35_v4  }
   0x5   :  { %255 = vmatpush3.bf16.xpose.msra.mxu0 %v77_v6 }
   0x6   :  { %13 = vsyncpa [#allocation4], 0  ;;  %v38_v8 = vld [vmem:[%s404_s2 + $0x18] sm:$0xff]  ;;  %v276_v9 = vld [vmem:[%s403_s1 + $0x8] sm:$0xff]   ;;  %v303_v14 = vmov 0.0   ;;  %vm304_vm1 = vmmov 0   ;;  %v224_v56 = vstv %s408_s6 }
   0x7   :  { %56 = vperm.xlu1 %274, %v38_v8   ;;  %v136_v10 = vld [vmem:[%s406_s4] sm:$0xff]  ;;  %v137_v11 = vld [vmem:[%s406_s4 + $0x8] sm:$0xff]  ;;  %260 = vmatprep.subr.bf16.mxu1 %v303_v14  ;;  %vm213_vm2 = vcmask 64512   ;;  %s305_s21 = smov [#allocation3]   ;;  %vm226_vm3 = vcmask 57344  }
   0x8   :  { %46 = vperm.xlu0 %273, %v36_v7   ;;  %v199_v12 = vld [vmem:[%s407_s5] sm:$0xff]  ;;  %v200_v13 = vld [vmem:[%s407_s5 + $0x8] sm:$0xff]  ;;  %264 = vmatprep.mubr.msk.bf16.mxu1 %vm304_vm1, %v303_v14  ;;  %s234_s22 = sshll.u32 %s305_s21, 4  ;;  %s235_s22 = int_to_ptr.vmem [resolvable:$true] %s234_s22 }
   0x9   :  { %v277_v33 = vld [vmem:[%s405_s3] sm:$0xff]   ;;  %s278_s23 = scalar_lea.vmem %s235_s22, 16  ;;  %s282_s24 = scalar_lea.vmem %s235_s22, 32 }
   0xa   :  { %p279_p0 = scmp.ne.s32.totalorder %s235_s22, %s278_s23  ;;  %p283_p1 = scmp.lt.s32.totalorder %s235_s22, %s235_s22 }
   0xb   :  { %145 = vperm.xlu1 %274, %v137_v11   ;;  %p284_p2 = scmp.lt.s32.totalorder %s282_s24, %s278_s23 }
   0xc   :  { %257 = vmatmul.mubr.msk.bf16.vlgmr.msra.gmra.mrb[0].mxu0 %vm69_vm0, %v276_v9  ;;  %140 = vperm.xlu0 %273, %v136_v10  }
   0xd   :  { %p285_p3 = por %p284_p2, %p283_p1 }
   0xf   :  { %208 = vperm.xlu1 %274, %v200_v13   ;;  %p286_p4 = pnand %p285_p3, %p279_p0 }
  0x10   :  { %203 = vperm.xlu0 %273, %v199_v12  }
  0x81   :  { %v52_v15 = vpop.permute.xlu1 %51 }
  0x83   :  { %v42_v16 = vpop.permute.xlu0 %41 }
  0x86   :  { %v57_v20 = vpop.permute.xlu1 %56 }
  0x87   :  { %v47_v23 = vpop.permute.xlu0 %46 }
  0x8a   :  { %v146_v35 = vpop.permute.xlu1 %145 }
  0x8b   :  { %v141_v34 = vpop.permute.xlu0 %140 }
  0x8e   :  { %v209_v46 = vpop.permute.xlu1 %208 }
  0x8f   :  { %v204_v43 = vpop.permute.xlu0 %203 }
  0xdf   :  { %v258_v17 = vpop.f32.mrb[0].mxu0 }
  0xe0   :  { %v122_v18 = vadd.f32 %v258_v17, %v52_v15  ;;  %v113_v19 = vpop.f32.mrb[1].mxu0 }
  0xe1   :  { %v114_v21 = vadd.f32 %v113_v19, %v42_v16  ;;  %v259_v22 = vpop.f32.mrb[2].mxu0 }
  0xe2   :  { %v125_v24 = vadd.f32 %v259_v22, %v57_v20  ;;  %v116_v25 = vpop.f32.mrb[3].mxu0  ;;  %v130_v27 = vmax.f32 %v122_v18, 0.0 }
  0xe3   :  { %v117_v26 = vadd.f32 %v116_v25, %v47_v23  ;;  %v128_v29 = vmax.f32 %v114_v21, 0.0 }
  0xe4   :  { %v131_v28 = vmax.f32 %v125_v24, 0.0 }
  0xe5   :  { %v129_v30 = vmax.f32 %v117_v26, 0.0 }
  0xe6   :  { %v135_v31 = vpack.c.bf16 %v131_v28, %v130_v27 }
  0xe7   :  { %v134_v32 = vpack.c.bf16 %v129_v30, %v128_v29 }
  0xe9   :  { %261 = vmatpush3.bf16.msra.mxu1 %v134_v32 }
  0xea   :  { %262 = vmatprep.subr.bf16.mxu1 %v303_v14 }
  0xed   :  { %263 = vmatpush3.bf16.msra.mxu1 %v135_v31 }
  0xf0   :  { %265 = vmatmul.mubr.msk.bf16.vlgmr.msra.gmra.mrb[0].mxu1 %vm69_vm0, %v277_v33 }
 0x1c3   :  { %v190_v36 = vpop.f32.mrb[0].mxu1 }
 0x1c4   :  { %v191_v37 = vadd.f32 %v190_v36, %v141_v34  ;;  %v266_v38 = vpop.f32.mrb[1].mxu1 }
 0x1c5   :  { %v193_v39 = vpop.f32.mrb[2].mxu1 }
 0x1c6   :  { %v197_v40 = vmax.f32 %v191_v37, 0.0  ;;  %v194_v41 = vadd.f32 %v193_v39, %v146_v35  ;;  %v267_v42 = vpop.f32.mrb[3].mxu1 }
 0x1c8   :  { %v211_v44 = vmul.f32 %v204_v43, %v197_v40  ;;  %v198_v45 = vmax.f32 %v194_v41, 0.0 }
 0x1ca   :  { %v212_v47 = vmul.f32 %v209_v46, %v198_v45  ;;  %v214_v48 = vsel %vm213_vm2, %v211_v44, 0.0 }
 0x1cc   :  { %v215_v49 = vsel %vm213_vm2, %v212_v47, 0.0 }
 0x1cd   :  { %v216_v50 = vadd.f32 %v215_v49, %v214_v48 }
 0x1cf   :  { %v217_v51 = vrot.slane %v216_v50, 4 }
 0x1d1   :  { %v218_v52 = vadd.f32 %v217_v51, %v216_v50 }
 0x1d3   :  { %v219_v53 = vrot.slane %v218_v52, 2 }
 0x1d5   :  { %v220_v54 = vadd.f32 %v219_v53, %v218_v52 }
 0x1d7   :  { %v221_v55 = vrot.slane %v220_v54, 1 }
 0x1d9   :  { %v222_v57 = vadd.f32 %v221_v55, %v220_v54 }
 0x1db   :  { %v225_v58 = vadd.f32 %v224_v56, %v222_v57 }
 0x1dd   :  { %227 = vst.msk [vmem:[#allocation3] sm:$0x1] %vm226_vm3, %v225_v58 }
 0x1de   :  { %289 = shalt.err (!%p286_p4)
}
 0x1df   :  { %s290_s27 = scalar_lea.hbm %s409_s7, 16 }
 0x1e0   :  { %p291_p5 = scmp.ne.s32.totalorder %s409_s7, %s290_s27  ;;  %p294_p6 = scmp.lt.u32.totalorder %s290_s27, %s409_s7 }
 0x1e2   :  { %p296_p7 = pnand %p294_p6, %p291_p5 }
 0x1e4   :  { %299 = shalt.err (!%p296_p7)
}
 0x1e5   :  { %237 = dma.vmem_to_hbm [thread:$0]  %s235_s22, 16, %s409_s7, [#allocation4]  }
 0x1e6   :  { %300 = dma.done.wait [#allocation4], 16  }
 0x1e7   :  { %301 = vsyncadd [#allocation4], 4294967280 }
 0x1e8   :  { %241 = vsyncpa [#allocation4], 1 }

</bundles_post_ra>
